<compile_context>
chip_gen: v7x
topology: tpu7x:2x2x1
jax: 0.10.0
libtpu: 0.0.40
codegen_flags: <defaults>
</compile_context>

<pallas_src>
import functools

import jax
import jax.numpy as jnp
from jax.experimental import pallas as pl
from jax.experimental.pallas import tpu as pltpu


def _round_up(n, m):
    return ((n + m - 1) // m) * m


def _autoencoder_kernel(x_ref, w1_ref, b1_ref, w2_ref, b2_ref, o_ref):
    # encoder: h = relu(x @ W1 + b1)   (all operands lane-padded to multiples of 128)
    h = jnp.dot(x_ref[...], w1_ref[...], preferred_element_type=jnp.float32)
    h = jnp.maximum(h + b1_ref[...], 0.0)
    # decoder: y = relu(h @ W2 + b2)
    y = jnp.dot(h, w2_ref[...], preferred_element_type=jnp.float32)
    y = jnp.maximum(y + b2_ref[...], 0.0)
    o_ref[...] = y.astype(o_ref.dtype)


def prepare_padded_params(w1, b1, w2, b2):
    """Zero-pad parameters once so every lane (last) dim is a multiple of 128.

    w1: (indim, hdim) -> (indim_p, hdim_p)
    b1: (1, hdim)     -> (1, hdim_p)
    w2: (hdim, indim) -> (hdim_p, indim_p)
    b2: (1, indim)    -> (1, indim_p)
    Zero padding keeps the forward pass numerically exact.
    """
    indim, hdim = w1.shape
    indim_p = _round_up(indim, 128)  # 484 -> 512
    hdim_p = _round_up(hdim, 128)    # 87  -> 128
    w1_p = jnp.pad(w1, ((0, indim_p - indim), (0, hdim_p - hdim)))
    b1_p = jnp.pad(b1, ((0, 0), (0, hdim_p - hdim)))
    w2_p = jnp.pad(w2, ((0, hdim_p - hdim), (0, indim_p - indim)))
    b2_p = jnp.pad(b2, ((0, 0), (0, indim_p - indim)))
    return (w1_p, b1_p, w2_p, b2_p), indim, indim_p


def autoencoder_forward(x, padded_params, indim, indim_p):
    """x: (B, indim) f32. Returns relu(relu(x@W1+b1)@W2+b2), shape (B, indim)."""
    w1_p, b1_p, w2_p, b2_p = padded_params
    B = x.shape[0]
    hdim_p = w1_p.shape[1]

    # Pad the contraction/lane axis of x (zeros -> exact result).
    x_p = jnp.pad(x, ((0, 0), (0, indim_p - indim)))

    flops = 2 * B * indim_p * hdim_p * 2  # two matmuls
    bytes_accessed = 4 * (
        B * indim_p            # x
        + indim_p * hdim_p     # W1
        + hdim_p               # b1
        + hdim_p * indim_p     # W2
        + indim_p              # b2
        + B * indim_p          # output
    )

    out_p = pl.pallas_call(
        _autoencoder_kernel,
        out_shape=jax.ShapeDtypeStruct((B, indim_p), x.dtype),
        # Full-extent blocks resident in VMEM, no grid -> no pipeline overhead.
        in_specs=[pl.BlockSpec(memory_space=pltpu.MemorySpace.VMEM)] * 5,
        out_specs=pl.BlockSpec(memory_space=pltpu.MemorySpace.VMEM),
        cost_estimate=pl.CostEstimate(
            flops=flops, transcendentals=0, bytes_accessed=bytes_accessed
        ),
    )(x_p, w1_p, b1_p, w2_p, b2_p)

    # Slice back to the true feature width (drops the zero-padded lanes).
    return out_p[:, :indim]


if __name__ == "__main__":
    indim, hdim, batch = 484, 87, 8

    key = jax.random.PRNGKey(0)
    kx, kw1, kb1, kw2, kb2 = jax.random.split(key, 5)

    # Deterministic parameter init (PyTorch-style uniform bounds 1/sqrt(fan_in)).
    # Weights are stored transposed vs PyTorch, i.e. (in_features, out_features).
    bound1 = 1.0 / jnp.sqrt(indim)
    bound2 = 1.0 / jnp.sqrt(hdim)
    w1 = jax.random.uniform(kw1, (indim, hdim), jnp.float32, -bound1, bound1)
    b1 = jax.random.uniform(kb1, (1, hdim), jnp.float32, -bound1, bound1)
    w2 = jax.random.uniform(kw2, (hdim, indim), jnp.float32, -bound2, bound2)
    b2 = jax.random.uniform(kb2, (1, indim), jnp.float32, -bound2, bound2)

    x = jax.random.normal(kx, (batch, indim), jnp.float32)

    padded_params, indim_, indim_p = prepare_padded_params(w1, b1, w2, b2)
    out = autoencoder_forward(x, padded_params, indim_, indim_p)
    out = jax.block_until_ready(out)

    # Pure-JAX reference check (unpadded f32 math).
    ref = jnp.maximum(jnp.maximum(x @ w1 + b1, 0.0) @ w2 + b2, 0.0)
    assert out.shape == (batch, indim)
    assert jnp.allclose(out, ref, atol=1e-4, rtol=1e-4)

    print("KERNEL_OK")
</pallas_src>

<mosaic_0001>
module attributes {stable_mosaic.version = 11 : i64} {
  func.func @_autoencoder_kernel(%arg0: memref<8x512xf32, #tpu.memory_space<vmem>>, %arg1: memref<512x128xf32, #tpu.memory_space<vmem>>, %arg2: memref<1x128xf32, #tpu.memory_space<vmem>>, %arg3: memref<128x512xf32, #tpu.memory_space<vmem>>, %arg4: memref<1x512xf32, #tpu.memory_space<vmem>>, %arg5: memref<8x512xf32, #tpu.memory_space<vmem>>) attributes {dimension_semantics = [], scalar_prefetch = 0 : i64, scratch_operands = 0 : i64, tpu.core_type = #tpu.core_type<tc>} {
    %c0 = arith.constant 0 : index
    %c0_0 = arith.constant 0 : index
    %0 = vector.load %arg0[%c0, %c0_0] : memref<8x512xf32, #tpu.memory_space<vmem>>, vector<8x512xf32>
    %c0_1 = arith.constant 0 : index
    %c0_2 = arith.constant 0 : index
    %1 = vector.load %arg1[%c0_1, %c0_2] : memref<512x128xf32, #tpu.memory_space<vmem>>, vector<512x128xf32>
    %cst = arith.constant dense<0.000000e+00> : vector<8x128xf32>
    %2 = tpu.matmul %0, %1, %cst {dimension_numbers = #tpu.dot_dimension_numbers<[1], [0], [0], [1], [0, 0, 1, 1], [], []>} : vector<8x512xf32>, vector<512x128xf32>, vector<8x128xf32> -> vector<8x128xf32>
    %c0_3 = arith.constant 0 : index
    %c0_4 = arith.constant 0 : index
    %3 = vector.load %arg2[%c0_3, %c0_4] : memref<1x128xf32, #tpu.memory_space<vmem>>, vector<1x128xf32>
    %4 = vector.broadcast %3 : vector<1x128xf32> to vector<8x128xf32>
    %5 = arith.addf %2, %4 : vector<8x128xf32>
    %cst_5 = arith.constant 0.000000e+00 : f32
    %6 = vector.broadcast %cst_5 : f32 to vector<8x128xf32>
    %7 = arith.maximumf %5, %6 : vector<8x128xf32>
    %c0_6 = arith.constant 0 : index
    %c0_7 = arith.constant 0 : index
    %8 = vector.load %arg3[%c0_6, %c0_7] : memref<128x512xf32, #tpu.memory_space<vmem>>, vector<128x512xf32>
    %cst_8 = arith.constant dense<0.000000e+00> : vector<8x512xf32>
    %9 = tpu.matmul %7, %8, %cst_8 {dimension_numbers = #tpu.dot_dimension_numbers<[1], [0], [0], [1], [0, 0, 1, 1], [], []>} : vector<8x128xf32>, vector<128x512xf32>, vector<8x512xf32> -> vector<8x512xf32>
    %c0_9 = arith.constant 0 : index
    %c0_10 = arith.constant 0 : index
    %10 = vector.load %arg4[%c0_9, %c0_10] : memref<1x512xf32, #tpu.memory_space<vmem>>, vector<1x512xf32>
    %11 = vector.broadcast %10 : vector<1x512xf32> to vector<8x512xf32>
    %12 = arith.addf %9, %11 : vector<8x512xf32>
    %cst_11 = arith.constant 0.000000e+00 : f32
    %13 = vector.broadcast %cst_11 : f32 to vector<8x512xf32>
    %14 = arith.maximumf %12, %13 : vector<8x512xf32>
    %c0_12 = arith.constant 0 : index
    %c0_13 = arith.constant 0 : index
    %15 = vector.load %arg5[%c0_12, %c0_13] : memref<8x512xf32, #tpu.memory_space<vmem>>, vector<8x512xf32>
    tpu.vector_store %arg5[%c0_12, %c0_13], %14 {strides = array<i32>} : memref<8x512xf32, #tpu.memory_space<vmem>>, vector<8x512xf32>,
    return
  }
}

</mosaic_0001>

<bundles_post_ra>
// kernel: tpu_custom_call.1
= control target key start
LH: loop header
LB: loop body
LE: loop exit
PB: predicated region body
PF: predicated region fallthrough
CT: control target
= control target key end

     0   :  { %10 = vsyncpa [#allocation3], 0  ;;  %s923_s0 = inlined_call_operand.hbm [shape: f32[8,512], index: 0, kind: input, shape index: {}]   ;;  %s924_s1 = inlined_call_operand.hbm [shape: f32[512,128], index: 1, kind: input, shape index: {}]   ;;  %s925_s2 = inlined_call_operand.vmem [shape: f32[1,128], index: 2, kind: input, shape index: {}]   ;;  %s926_s3 = inlined_call_operand.hbm [shape: f32[128,512], index: 3, kind: input, shape index: {}]   ;;  %s927_s4 = inlined_call_operand.vmem [shape: f32[1,512], index: 4, kind: input, shape index: {}]   ;;  %s928_s5 = inlined_call_operand.hbm [shape: f32[8,512], index: 5, kind: output, shape index: {}]  }
   0x1   :  { %11 = vsyncpa [#allocation6], 0 }
   0x2   :  { %12 = vsyncpa [#allocation4], 0  ;;  %s830_s18 = smov [#allocation5]   ;;  %s736_s22 = scalar_lea.hbm %s924_s1, 8192 }
   0x3   :  { %s28_s19 = sshll.u32 %s830_s18, 4  ;;  %p737_p0 = scmp.ne.s32.totalorder %s924_s1, %s736_s22  ;;  %s29_s19 = int_to_ptr.vmem [resolvable:$true] %s28_s19 }
   0x4   :  { %p740_p1 = scmp.lt.u32.totalorder %s736_s22, %s924_s1 }
   0x6   :  { %p742_p2 = pnand %p740_p1, %p737_p0 }
   0x8   :  { %745 = shalt.err (!%p742_p2)
}
   0x9   :  { %s746_s27 = scalar_lea.vmem %s29_s19, 8192  ;;  %p751_p4 = scmp.lt.s32.totalorder %s29_s19, %s29_s19 }
   0xa   :  { %p747_p3 = scmp.ne.s32.totalorder %s29_s19, %s746_s27  ;;  %p752_p5 = scmp.lt.s32.totalorder %s746_s27, %s746_s27 }
   0xc   :  { %p753_p6 = por %p752_p5, %p751_p4 }
   0xe   :  { %p754_p7 = pnand %p753_p6, %p747_p3 }
  0x10   :  { %757 = shalt.err (!%p754_p7)
}
  0x11   :  { %s831_s28 = smov 128   ;;  %s832_s29 = smov 8  }
  0x12   :  { %34 = dma.hbm_to_vmem [thread:$0]  %s924_s1, 8192, %s29_s19, [#allocation6], %s831_s28, %s831_s28, %s832_s29  }
  0x13   :  { %s833_s7 = smov [#allocation2]   ;;  %s834_s9 = smov [#allocation7]  }
  0x14   :  { %s19_s8 = sshll.u32 %s833_s7, 4  ;;  %s42_s10 = sshll.u32 %s834_s9, 4  ;;  %s20_s8 = int_to_ptr.vmem [resolvable:$true] %s19_s8  ;;  %s43_s10 = int_to_ptr.vmem [resolvable:$true] %s42_s10 }
  0x15   :  { %s758_s13 = scalar_lea.hbm %s923_s0, 512 }
  0x16   :  { %p759_p8 = scmp.ne.s32.totalorder %s923_s0, %s758_s13  ;;  %p762_p9 = scmp.lt.u32.totalorder %s758_s13, %s923_s0 }
  0x18   :  { %p764_p10 = pnand %p762_p9, %p759_p8 }
  0x1a   :  { %767 = shalt.err (!%p764_p10)
}
  0x1b   :  { %s768_s1 = scalar_lea.vmem %s20_s8, 512  ;;  %p773_p12 = scmp.lt.s32.totalorder %s20_s8, %s20_s8 }
  0x1c   :  { %p769_p11 = scmp.ne.s32.totalorder %s20_s8, %s768_s1  ;;  %p774_p13 = scmp.lt.s32.totalorder %s768_s1, %s768_s1 }
  0x1e   :  { %p775_p0 = por %p774_p13, %p773_p12 }
  0x20   :  { %p776_p1 = pnand %p775_p0, %p769_p11 }
  0x22   :  { %779 = shalt.err (!%p776_p1)
}
  0x23   :  { %22 = dma.hbm_to_vmem [thread:$0]  %s923_s0, 512, %s20_s8, [#allocation3]  }
  0x24   :  { %s780_s22 = scalar_lea.hbm %s926_s3, 8192 }
  0x25   :  { %p781_p2 = scmp.ne.s32.totalorder %s926_s3, %s780_s22  ;;  %p784_p3 = scmp.lt.u32.totalorder %s780_s22, %s926_s3 }
  0x27   :  { %p786_p4 = pnand %p784_p3, %p781_p2 }
  0x29   :  { %789 = shalt.err (!%p786_p4)
}
  0x2a   :  { %s790_s27 = scalar_lea.vmem %s43_s10, 8192  ;;  %p795_p6 = scmp.lt.s32.totalorder %s43_s10, %s43_s10 }
  0x2b   :  { %p791_p5 = scmp.ne.s32.totalorder %s43_s10, %s790_s27  ;;  %p796_p7 = scmp.lt.s32.totalorder %s790_s27, %s790_s27 }
  0x2d   :  { %p797_p8 = por %p796_p7, %p795_p6 }
  0x2f   :  { %p798_p9 = pnand %p797_p8, %p791_p5 }
  0x31   :  { %801 = shalt.err (!%p798_p9)
}
  0x32   :  { %s835_s0 = smov 512   ;;  %s836_s28 = smov 32  }
  0x33   :  { %48 = dma.hbm_to_vmem [thread:$0]  %s926_s3, 8192, %s43_s10, [#allocation6], %s835_s0, %s835_s0, %s836_s28  }
  0x34   :  { %824 = dma.done.wait [#allocation3], 512  }
  0x35   :  { %825 = vsyncadd [#allocation3], 4294966784 }
  0x36   :  { %826 = dma.done.wait [#allocation6], 16384  }
  0x37   :  { %827 = vsyncadd [#allocation6], 4294950912  ;;  %v80_v0 = vld [vmem:[#allocation5 + $0x80] sm:$0xff]  ;;  %v81_v1 = vld [vmem:[#allocation5 + $0x88] sm:$0xff] }
  0x38   :  { %v64_v2 = vld [vmem:[#allocation5] sm:$0xff]  ;;  %v599_v3 = vpack.c.bf16 %v81_v1, %v80_v0  ;;  %v65_v4 = vld [vmem:[#allocation5 + $0x8] sm:$0xff]  ;;  %v82_v11 = vld [vmem:[#allocation5 + $0x90] sm:$0xff] }
  0x39   :  { %v112_v5 = vld [vmem:[#allocation5 + $0x180] sm:$0xff]  ;;  %v113_v6 = vld [vmem:[#allocation5 + $0x188] sm:$0xff]  ;;  %v601_v7 = vpack.c.bf16 %v65_v4, %v64_v2  ;;  %v83_v13 = vld [vmem:[#allocation5 + $0x98] sm:$0xff] }
  0x3a   :  { %v631_v8 = vpack.c.bf16 %v113_v6, %v112_v5  ;;  %v96_v9 = vld [vmem:[#allocation5 + $0x100] sm:$0xff]  ;;  %v97_v10 = vld [vmem:[#allocation5 + $0x108] sm:$0xff]  ;;  %600 = vmatprep.subr.bf16.mxu0 %v599_v3  ;;  %v66_v14 = vld [vmem:[#allocation5 + $0x10] sm:$0xff]  ;;  %v603_v16 = vpack.c.bf16 %v83_v13, %v82_v11 }
  0x3b   :  { %v633_v12 = vpack.c.bf16 %v97_v10, %v96_v9  ;;  %v67_v15 = vld [vmem:[#allocation5 + $0x18] sm:$0xff]  ;;  %602 = vmatpush3.bf16.msra.mxu0 %v601_v7  ;;  %v114_v18 = vld [vmem:[#allocation5 + $0x190] sm:$0xff]  ;;  %v84_v23 = vld [vmem:[#allocation5 + $0xa0] sm:$0xff] }
  0x3c   :  { %632 = vmatprep.subr.bf16.mxu1 %v631_v8  ;;  %v605_v17 = vpack.c.bf16 %v67_v15, %v66_v14  ;;  %v115_v19 = vld [vmem:[#allocation5 + $0x198] sm:$0xff]  ;;  %v98_v20 = vld [vmem:[#allocation5 + $0x110] sm:$0xff]  ;;  %v85_v24 = vld [vmem:[#allocation5 + $0xa8] sm:$0xff]  ;;  %604 = vmatprep.subr.bf16.mxu0 %v603_v16 }
  0x3d   :  { %634 = vmatpush3.bf16.msra.mxu1 %v633_v12  ;;  %v635_v21 = vpack.c.bf16 %v115_v19, %v114_v18  ;;  %v99_v22 = vld [vmem:[#allocation5 + $0x118] sm:$0xff]  ;;  %v607_v26 = vpack.c.bf16 %v85_v24, %v84_v23  ;;  %v68_v27 = vld [vmem:[#allocation5 + $0x20] sm:$0xff]  ;;  %v69_v28 = vld [vmem:[#allocation5 + $0x28] sm:$0xff] }
  0x3e   :  { %v637_v25 = vpack.c.bf16 %v99_v22, %v98_v20  ;;  %v116_v29 = vld [vmem:[#allocation5 + $0x1a0] sm:$0xff]  ;;  %v117_v30 = vld [vmem:[#allocation5 + $0x1a8] sm:$0xff]  ;;  %v609_v33 = vpack.c.bf16 %v69_v28, %v68_v27  ;;  %v86_v35 = vld [vmem:[#allocation5 + $0xb0] sm:$0xff] }
  0x3f   :  { %636 = vmatprep.subr.bf16.mxu1 %v635_v21  ;;  %v100_v31 = vld [vmem:[#allocation5 + $0x120] sm:$0xff]  ;;  %v101_v32 = vld [vmem:[#allocation5 + $0x128] sm:$0xff]  ;;  %606 = vmatpush3.bf16.msra.mxu0 %v605_v17  ;;  %v639_v34 = vpack.c.bf16 %v117_v30, %v116_v29  ;;  %v87_v36 = vld [vmem:[#allocation5 + $0xb8] sm:$0xff] }
  0x40   :  { %v70_v37 = vld [vmem:[#allocation5 + $0x30] sm:$0xff]  ;;  %608 = vmatprep.subr.bf16.mxu0 %v607_v26  ;;  %v641_v38 = vpack.c.bf16 %v101_v32, %v100_v31  ;;  %v611_v39 = vpack.c.bf16 %v87_v36, %v86_v35  ;;  %v71_v40 = vld [vmem:[#allocation5 + $0x38] sm:$0xff]  ;;  %v88_v46 = vld [vmem:[#allocation5 + $0xc0] sm:$0xff] }
  0x41   :  { %638 = vmatpush3.bf16.msra.mxu1 %v637_v25  ;;  %v118_v41 = vld [vmem:[#allocation5 + $0x1b0] sm:$0xff]  ;;  %v119_v42 = vld [vmem:[#allocation5 + $0x1b8] sm:$0xff]  ;;  %v89_v47 = vld [vmem:[#allocation5 + $0xc8] sm:$0xff]  ;;  %v613_v48 = vpack.c.bf16 %v71_v40, %v70_v37 }
  0x42   :  { %640 = vmatprep.subr.bf16.mxu1 %v639_v34  ;;  %v643_v43 = vpack.c.bf16 %v119_v42, %v118_v41  ;;  %v102_v44 = vld [vmem:[#allocation5 + $0x130] sm:$0xff]  ;;  %v103_v45 = vld [vmem:[#allocation5 + $0x138] sm:$0xff]  ;;  %v120_v49 = vld [vmem:[#allocation5 + $0x1c0] sm:$0xff]  ;;  %v615_v52 = vpack.c.bf16 %v89_v47, %v88_v46 }
  0x43   :  { %610 = vmatpush3.bf16.msra.mxu0 %v609_v33  ;;  %v121_v50 = vld [vmem:[#allocation5 + $0x1c8] sm:$0xff]  ;;  %v645_v51 = vpack.c.bf16 %v103_v45, %v102_v44  ;;  %v72_v53 = vld [vmem:[#allocation5 + $0x40] sm:$0xff]  ;;  %v90_v58 = vld [vmem:[#allocation5 + $0xd0] sm:$0xff] }
  0x44   :  { %612 = vmatprep.subr.bf16.mxu0 %v611_v39  ;;  %v73_v54 = vld [vmem:[#allocation5 + $0x48] sm:$0xff]  ;;  %v104_v55 = vld [vmem:[#allocation5 + $0x140] sm:$0xff]  ;;  %v647_v56 = vpack.c.bf16 %v121_v50, %v120_v49  ;;  %v91_v59 = vld [vmem:[#allocation5 + $0xd8] sm:$0xff] }
  0x45   :  { %642 = vmatpush3.bf16.msra.mxu1 %v641_v38  ;;  %v105_v57 = vld [vmem:[#allocation5 + $0x148] sm:$0xff]  ;;  %v122_v60 = vld [vmem:[#allocation5 + $0x1d0] sm:$0xff]  ;;  %v123_v61 = vld [vmem:[#allocation5 + $0x1d8] sm:$0xff]  ;;  %v617_v62 = vpack.c.bf16 %v73_v54, %v72_v53  ;;  %v619_v0 = vpack.c.bf16 %v91_v59, %v90_v58 }
  0x46   :  { %644 = vmatprep.subr.bf16.mxu1 %v643_v43  ;;  %v649_v63 = vpack.c.bf16 %v105_v57, %v104_v55  ;;  %v74_v1 = vld [vmem:[#allocation5 + $0x50] sm:$0xff]  ;;  %v75_v2 = vld [vmem:[#allocation5 + $0x58] sm:$0xff]  ;;  %v651_v4 = vpack.c.bf16 %v123_v61, %v122_v60  ;;  %v92_v6 = vld [vmem:[#allocation5 + $0xe0] sm:$0xff] }
  0x47   :  { %614 = vmatpush3.bf16.msra.mxu0 %v613_v48  ;;  %v106_v3 = vld [vmem:[#allocation5 + $0x150] sm:$0xff]  ;;  %v107_v5 = vld [vmem:[#allocation5 + $0x158] sm:$0xff]  ;;  %v93_v7 = vld [vmem:[#allocation5 + $0xe8] sm:$0xff]  ;;  %v621_v10 = vpack.c.bf16 %v75_v2, %v74_v1 }
  0x48   :  { %616 = vmatprep.subr.bf16.mxu0 %v615_v52  ;;  %v124_v8 = vld [vmem:[#allocation5 + $0x1e0] sm:$0xff]  ;;  %v125_v9 = vld [vmem:[#allocation5 + $0x1e8] sm:$0xff]  ;;  %v653_v13 = vpack.c.bf16 %v107_v5, %v106_v3  ;;  %v623_v14 = vpack.c.bf16 %v93_v7, %v92_v6  ;;  %v94_v19 = vld [vmem:[#allocation5 + $0xf0] sm:$0xff] }
  0x49   :  { %646 = vmatpush3.bf16.msra.mxu1 %v645_v51  ;;  %v76_v11 = vld [vmem:[#allocation5 + $0x60] sm:$0xff]  ;;  %v77_v12 = vld [vmem:[#allocation5 + $0x68] sm:$0xff]  ;;  %v655_v18 = vpack.c.bf16 %v125_v9, %v124_v8  ;;  %v95_v20 = vld [vmem:[#allocation5 + $0xf8] sm:$0xff] }
  0x4a   :  { %648 = vmatprep.subr.bf16.mxu1 %v647_v56  ;;  %v108_v15 = vld [vmem:[#allocation5 + $0x160] sm:$0xff]  ;;  %v109_v16 = vld [vmem:[#allocation5 + $0x168] sm:$0xff]  ;;  %v63_v21 = vld [vmem:[#allocation2 + $0x18] sm:$0xff]  ;;  %v625_v24 = vpack.c.bf16 %v77_v12, %v76_v11  ;;  %v627_v26 = vpack.c.bf16 %v95_v20, %v94_v19 }
  0x4b   :  { %618 = vmatpush3.bf16.msra.mxu0 %v617_v62  ;;  %v61_v17 = vld [vmem:[#allocation2 + $0x8] sm:$0xff]  ;;  %v126_v22 = vld [vmem:[#allocation5 + $0x1f0] sm:$0xff]  ;;  %v127_v23 = vld [vmem:[#allocation5 + $0x1f8] sm:$0xff]  ;;  %269 = vmatprep.mubr.f32.mxu1 %v63_v21  ;;  %v657_v25 = vpack.c.bf16 %v109_v16, %v108_v15 }
  0x4c   :  { %620 = vmatprep.subr.bf16.mxu0 %v619_v0  ;;  %199 = vmatprep.mubr.f32.mxu0 %v61_v17  ;;  %v78_v27 = vld [vmem:[#allocation5 + $0x70] sm:$0xff]  ;;  %v79_v28 = vld [vmem:[#allocation5 + $0x78] sm:$0xff]  ;;  %v659_v30 = vpack.c.bf16 %v127_v23, %v126_v22  ;;  %v277_v32 = vld [vmem:[#allocation7 + $0x8] sm:$0xff] }
  0x4d   :  { %650 = vmatpush3.bf16.msra.mxu1 %v649_v63  ;;  %v110_v29 = vld [vmem:[#allocation5 + $0x170] sm:$0xff]  ;;  %v111_v31 = vld [vmem:[#allocation5 + $0x178] sm:$0xff]  ;;  %v281_v33 = vld [vmem:[#allocation7 + $0x28] sm:$0xff]  ;;  %v629_v36 = vpack.c.bf16 %v79_v28, %v78_v27 }
  0x4e   :  { %652 = vmatprep.subr.bf16.mxu1 %v651_v4  ;;  %v279_v34 = vld [vmem:[#allocation7 + $0x18] sm:$0xff]  ;;  %v661_v37 = vpack.c.bf16 %v111_v31, %v110_v29  ;;  %v663_v38 = vpack.c.bf16 %v281_v33, %v277_v32  ;;  %v276_v39 = vld [vmem:[#allocation7] sm:$0xff]  ;;  %v278_v41 = vld [vmem:[#allocation7 + $0x10] sm:$0xff] }
  0x4f   :  { %622 = vmatpush3.bf16.msra.mxu0 %v621_v10  ;;  %v283_v35 = vld [vmem:[#allocation7 + $0x38] sm:$0xff]  ;;  %v280_v40 = vld [vmem:[#allocation7 + $0x20] sm:$0xff]  ;;  %v282_v43 = vld [vmem:[#allocation7 + $0x30] sm:$0xff] }
  0x50   :  { %624 = vmatprep.subr.bf16.mxu0 %v623_v14  ;;  %v695_v42 = vpack.c.bf16 %v283_v35, %v279_v34  ;;  %v285_v44 = vld [vmem:[#allocation7 + $0x48] sm:$0xff]  ;;  %v287_v46 = vld [vmem:[#allocation7 + $0x58] sm:$0xff]  ;;  %v60_v48 = vld [vmem:[#allocation2] sm:$0xff]  ;;  %v665_v50 = vpack.c.bf16 %v280_v40, %v276_v39  ;;  %v697_v51 = vpack.c.bf16 %v282_v43, %v278_v41 }
  0x51   :  { %654 = vmatpush3.bf16.msra.mxu1 %v653_v13  ;;  %v289_v45 = vld [vmem:[#allocation7 + $0x68] sm:$0xff]  ;;  %v291_v47 = vld [vmem:[#allocation7 + $0x78] sm:$0xff]  ;;  %v62_v49 = vld [vmem:[#allocation2 + $0x10] sm:$0xff] }
  0x52   :  { %656 = vmatprep.subr.bf16.mxu1 %v655_v18  ;;  %v667_v52 = vpack.c.bf16 %v289_v45, %v285_v44  ;;  %v284_v53 = vld [vmem:[#allocation7 + $0x40] sm:$0xff]  ;;  %v286_v55 = vld [vmem:[#allocation7 + $0x50] sm:$0xff]  ;;  %v699_v56 = vpack.c.bf16 %v291_v47, %v287_v46  ;;  %v293_v58 = vld [vmem:[#allocation7 + $0x88] sm:$0xff] }
  0x53   :  { %626 = vmatpush3.bf16.msra.mxu0 %v625_v24  ;;  %v288_v54 = vld [vmem:[#allocation7 + $0x60] sm:$0xff]  ;;  %v290_v57 = vld [vmem:[#allocation7 + $0x70] sm:$0xff]  ;;  %v297_v59 = vld [vmem:[#allocation7 + $0xa8] sm:$0xff] }
  0x54   :  { %628 = vmatprep.subr.bf16.mxu0 %v627_v26  ;;  %v295_v60 = vld [vmem:[#allocation7 + $0x98] sm:$0xff]  ;;  %v669_v62 = vpack.c.bf16 %v288_v54, %v284_v53  ;;  %v701_v63 = vpack.c.bf16 %v290_v57, %v286_v55  ;;  %v671_v0 = vpack.c.bf16 %v297_v59, %v293_v58  ;;  %v292_v1 = vld [vmem:[#allocation7 + $0x80] sm:$0xff]  ;;  %v294_v3 = vld [vmem:[#allocation7 + $0x90] sm:$0xff] }
  0x55   :  { %658 = vmatpush3.bf16.msra.mxu1 %v657_v25  ;;  %v299_v61 = vld [vmem:[#allocation7 + $0xb8] sm:$0xff]  ;;  %v296_v2 = vld [vmem:[#allocation7 + $0xa0] sm:$0xff]  ;;  %v298_v5 = vld [vmem:[#allocation7 + $0xb0] sm:$0xff] }
  0x56   :  { %660 = vmatprep.subr.bf16.mxu1 %v659_v30  ;;  %v703_v4 = vpack.c.bf16 %v299_v61, %v295_v60  ;;  %v301_v6 = vld [vmem:[#allocation7 + $0xc8] sm:$0xff]  ;;  %v303_v8 = vld [vmem:[#allocation7 + $0xd8] sm:$0xff]  ;;  %v673_v10 = vpack.c.bf16 %v296_v2, %v292_v1  ;;  %v705_v11 = vpack.c.bf16 %v298_v5, %v294_v3  ;;  %v300_v13 = vld [vmem:[#allocation7 + $0xc0] sm:$0xff] }
  0x57   :  { %630 = vmatpush3.bf16.msra.mxu0 %v629_v36  ;;  %v305_v7 = vld [vmem:[#allocation7 + $0xe8] sm:$0xff]  ;;  %v307_v9 = vld [vmem:[#allocation7 + $0xf8] sm:$0xff]  ;;  %v304_v14 = vld [vmem:[#allocation7 + $0xe0] sm:$0xff] }
  0x58   :  { %664 = vmatprep.subr.bf16.mxu0 %v663_v38  ;;  %v675_v12 = vpack.c.bf16 %v305_v7, %v301_v6  ;;  %v302_v15 = vld [vmem:[#allocation7 + $0xd0] sm:$0xff]  ;;  %v707_v16 = vpack.c.bf16 %v307_v9, %v303_v8  ;;  %v309_v18 = vld [vmem:[#allocation7 + $0x108] sm:$0xff]  ;;  %v311_v20 = vld [vmem:[#allocation7 + $0x118] sm:$0xff]  ;;  %v677_v22 = vpack.c.bf16 %v304_v14, %v300_v13 }
  0x59   :  { %662 = vmatpush3.bf16.msra.mxu1 %v661_v37  ;;  %v306_v17 = vld [vmem:[#allocation7 + $0xf0] sm:$0xff]  ;;  %v313_v19 = vld [vmem:[#allocation7 + $0x128] sm:$0xff]  ;;  %v315_v21 = vld [vmem:[#allocation7 + $0x138] sm:$0xff] }
  0x5a   :  { %696 = vmatprep.subr.bf16.mxu1 %v695_v42  ;;  %200 = vmatmul.mubr.f32.vlgmr.msra.gmra.mrb[0].mxu0 %v60_v48  ;;  %v709_v23 = vpack.c.bf16 %v306_v17, %v302_v15  ;;  %v679_v24 = vpack.c.bf16 %v313_v19, %v309_v18  ;;  %v308_v25 = vld [vmem:[#allocation7 + $0x100] sm:$0xff]  ;;  %v310_v27 = vld [vmem:[#allocation7 + $0x110] sm:$0xff]  ;;  %v711_v28 = vpack.c.bf16 %v315_v21, %v311_v20  ;;  %v317_v30 = vld [vmem:[#allocation7 + $0x148] sm:$0xff]  ;;  %v342_v15 = vlaneseq }
  0x5b   :  { %666 = vmatpush1.bf16.msra.mxu0 %v665_v50  ;;  %v312_v26 = vld [vmem:[#allocation7 + $0x120] sm:$0xff]  ;;  %v314_v29 = vld [vmem:[#allocation7 + $0x130] sm:$0xff]  ;;  %v321_v31 = vld [vmem:[#allocation7 + $0x168] sm:$0xff] }
  0x5c   :  { %270 = vmatmul.mubr.f32.vlgmr.msra.gmra.mrb[0].mxu1 %v62_v49  ;;  %668 = vmatprep.subr.bf16.mxu0 %v667_v52  ;;  %v319_v32 = vld [vmem:[#allocation7 + $0x158] sm:$0xff]  ;;  %v681_v34 = vpack.c.bf16 %v312_v26, %v308_v25  ;;  %v713_v35 = vpack.c.bf16 %v314_v29, %v310_v27  ;;  %v683_v36 = vpack.c.bf16 %v321_v31, %v317_v30  ;;  %v316_v37 = vld [vmem:[#allocation7 + $0x140] sm:$0xff]  ;;  %v318_v40 = vld [vmem:[#allocation7 + $0x150] sm:$0xff] }
  0x5d   :  { %698 = vmatpush1.bf16.msra.mxu1 %v697_v51  ;;  %v323_v33 = vld [vmem:[#allocation7 + $0x178] sm:$0xff]  ;;  %v320_v38 = vld [vmem:[#allocation7 + $0x160] sm:$0xff]  ;;  %v322_v41 = vld [vmem:[#allocation7 + $0x170] sm:$0xff] }
  0x5e   :  { %700 = vmatprep.subr.bf16.mxu1 %v699_v56  ;;  %v715_v39 = vpack.c.bf16 %v323_v33, %v319_v32  ;;  %v685_v42 = vpack.c.bf16 %v320_v38, %v316_v37  ;;  %v717_v43 = vpack.c.bf16 %v322_v41, %v318_v40  ;;  %v325_v44 = vld [vmem:[#allocation7 + $0x188] sm:$0xff]  ;;  %v327_v46 = vld [vmem:[#allocation7 + $0x198] sm:$0xff]  ;;  %v324_v49 = vld [vmem:[#allocation7 + $0x180] sm:$0xff] }
  0x5f   :  { %670 = vmatpush1.bf16.msra.mxu0 %v669_v62  ;;  %v329_v45 = vld [vmem:[#allocation7 + $0x1a8] sm:$0xff]  ;;  %v331_v48 = vld [vmem:[#allocation7 + $0x1b8] sm:$0xff]  ;;  %v328_v51 = vld [vmem:[#allocation7 + $0x1a0] sm:$0xff] }
  0x60   :  { %672 = vmatprep.subr.bf16.mxu0 %v671_v0  ;;  %v687_v47 = vpack.c.bf16 %v329_v45, %v325_v44  ;;  %v719_v50 = vpack.c.bf16 %v331_v48, %v327_v46  ;;  %v326_v52 = vld [vmem:[#allocation7 + $0x190] sm:$0xff]  ;;  %v689_v54 = vpack.c.bf16 %v328_v51, %v324_v49  ;;  %v333_v56 = vld [vmem:[#allocation7 + $0x1c8] sm:$0xff]  ;;  %v335_v58 = vld [vmem:[#allocation7 + $0x1d8] sm:$0xff] }
  0x61   :  { %702 = vmatpush1.bf16.msra.mxu1 %v701_v63  ;;  %v330_v53 = vld [vmem:[#allocation7 + $0x1b0] sm:$0xff]  ;;  %v337_v57 = vld [vmem:[#allocation7 + $0x1e8] sm:$0xff]  ;;  %v339_v60 = vld [vmem:[#allocation7 + $0x1f8] sm:$0xff] }
  0x62   :  { %704 = vmatprep.subr.bf16.mxu1 %v703_v4  ;;  %v721_v55 = vpack.c.bf16 %v330_v53, %v326_v52  ;;  %v691_v59 = vpack.c.bf16 %v337_v57, %v333_v56  ;;  %v332_v61 = vld [vmem:[#allocation7 + $0x1c0] sm:$0xff]  ;;  %v723_v63 = vpack.c.bf16 %v339_v60, %v335_v58  ;;  %v334_v1 = vld [vmem:[#allocation7 + $0x1d0] sm:$0xff]  ;;  %v837_v4 = vmov 0.0  }
  0x63   :  { %674 = vmatpush1.bf16.msra.mxu0 %v673_v10  ;;  %v336_v62 = vld [vmem:[#allocation7 + $0x1e0] sm:$0xff]  ;;  %v338_v2 = vld [vmem:[#allocation7 + $0x1f0] sm:$0xff]  ;;  %426 = vmatprep.mubr.f32.mxu0 %v837_v4 }
  0x64   :  { %676 = vmatprep.subr.bf16.mxu0 %v675_v12  ;;  %v693_v0 = vpack.c.bf16 %v336_v62, %v332_v61  ;;  %v725_v3 = vpack.c.bf16 %v338_v2, %v334_v1  ;;  %497 = vmatprep.mubr.f32.mxu1 %v837_v4  ;;  %v528_v6 = vld [vmem:[%s925_s2] ss:$0 sm:$0xff]  ;;  %s838_s2 = smov [#allocation8]  }
  0x65   :  { %706 = vmatpush1.bf16.msra.mxu1 %v705_v11  ;;  %v340_v19 = vld [vmem:[%s927_s4] sm:$0xf]  ;;  %s518_s9 = sshll.u32 %s838_s2, 4  ;;  %s519_s9 = int_to_ptr.vmem [resolvable:$true] %s518_s9 }
  0x66   :  { %708 = vmatprep.subr.bf16.mxu1 %v707_v16  ;;  %v343_v16 = vshrl.u32 %v342_v15, 7  ;;  %s802_s4 = scalar_lea.vmem %s519_s9, 512  ;;  %p807_p11 = scmp.lt.s32.totalorder %s519_s9, %s519_s9 }
  0x67   :  { %678 = vmatpush1.bf16.msra.mxu0 %v677_v22  ;;  %p803_p10 = scmp.ne.s32.totalorder %s519_s9, %s802_s4  ;;  %p808_p12 = scmp.lt.s32.totalorder %s802_s4, %s802_s4 }
  0x68   :  { %680 = vmatprep.subr.bf16.mxu0 %v679_v24  ;;  %v344_v17 = vsub.s32 0, %v343_v16  ;;  %v352_v18 = vsub.s32 2, %v343_v16  ;;  %v348_v20 = vsub.s32 1, %v343_v16  ;;  %v356_v21 = vsub.s32 3, %v343_v16 }
  0x69   :  { %710 = vmatpush1.bf16.msra.mxu1 %v709_v23  ;;  %p809_p13 = por %p808_p12, %p807_p11 }
  0x6a   :  { %712 = vmatprep.subr.bf16.mxu1 %v711_v28  ;;  %v345_v22 = vrot.slane %v340_v19, %v344_v17  ;;  %v353_v23 = vrot.slane %v340_v19, %v352_v18  ;;  %v349_v24 = vrot.slane %v340_v19, %v348_v20  ;;  %v357_v25 = vrot.slane %v340_v19, %v356_v21 }
  0x6b   :  { %682 = vmatpush1.bf16.msra.mxu0 %v681_v34  ;;  %p810_p0 = pnand %p809_p13, %p803_p10 }
  0x6c   :  { %684 = vmatprep.subr.bf16.mxu0 %v683_v36 }
  0x6d   :  { %714 = vmatpush1.bf16.msra.mxu1 %v713_v35 }
  0x6e   :  { %716 = vmatprep.subr.bf16.mxu1 %v715_v39 }
  0x6f   :  { %686 = vmatpush1.bf16.msra.mxu0 %v685_v42 }
  0x70   :  { %688 = vmatprep.subr.bf16.mxu0 %v687_v47 }
  0x71   :  { %718 = vmatpush1.bf16.msra.mxu1 %v717_v43 }
  0x72   :  { %720 = vmatprep.subr.bf16.mxu1 %v719_v50 }
  0x73   :  { %690 = vmatpush1.bf16.msra.mxu0 %v689_v54 }
  0x74   :  { %692 = vmatprep.subr.bf16.mxu0 %v691_v59 }
  0x75   :  { %722 = vmatpush1.bf16.msra.mxu1 %v721_v55 }
  0x76   :  { %724 = vmatprep.subr.bf16.mxu1 %v723_v63 }
  0x77   :  { %694 = vmatpush1.bf16.msra.mxu0 %v693_v0 }
  0x79   :  { %726 = vmatpush1.bf16.msra.mxu1 %v725_v3 }
 0x12d   :  { %v561_v5 = vpop.f32.mrb[0].mxu0 }
 0x12e   :  { %v562_v7 = vpop.f32.mrb[1].mxu0 }
 0x12f   :  { %v596_v8 = vpop.f32.mrb[0].mxu1  ;;  %v563_v9 = vadd.f32 %v562_v7, %v561_v5 }
 0x130   :  { %v597_v10 = vpop.f32.mrb[1].mxu1 }
 0x131   :  { %v598_v11 = vadd.f32 %v597_v10, %v596_v8  ;;  %v202_v12 = vadd.f32 %v563_v9, %v528_v6 }
 0x133   :  { %v272_v13 = vadd.f32 %v598_v11, %v202_v12 }
 0x135   :  { %v275_v14 = vmax.f32 %v272_v13, 0.0 }
 0x137   :  { %427 = vmatmul.mubr.f32.vlgmr.msra.gmra.mrb[2].mxu0 %v275_v14  ;;  %498 = vmatmul.mubr.f32.vlgmr.msra.gmra.mrb[2].mxu1 %v275_v14 }
 0x20a   :  { %v428_v26 = vpop.f32.mrb[2].mxu0  ;;  %v499_v27 = vpop.f32.mrb[2].mxu1 }
 0x20b   :  { %v429_v28 = vadd.f32 %v428_v26, %v345_v22  ;;  %v500_v29 = vadd.f32 %v499_v27, %v353_v23  ;;  %v430_v30 = vpop.f32.mrb[3].mxu0  ;;  %v501_v31 = vpop.f32.mrb[3].mxu1 }
 0x20c   :  { %v431_v32 = vadd.f32 %v430_v30, %v349_v24  ;;  %v502_v33 = vadd.f32 %v501_v31, %v357_v25 }
 0x20d   :  { %v504_v34 = vmax.f32 %v429_v28, 0.0  ;;  %v506_v35 = vmax.f32 %v500_v29, 0.0 }
 0x20e   :  { %v505_v36 = vmax.f32 %v431_v32, 0.0  ;;  %v507_v37 = vmax.f32 %v502_v33, 0.0 }
 0x20f   :  { %508 = vst [vmem:[#allocation8] sm:$0xff] %v504_v34  ;;  %510 = vst [vmem:[#allocation8 + $0x10] sm:$0xff] %v506_v35 }
 0x210   :  { %509 = vst [vmem:[#allocation8 + $0x8] sm:$0xff] %v505_v36  ;;  %511 = vst [vmem:[#allocation8 + $0x18] sm:$0xff] %v507_v37 }
 0x211   :  { %813 = shalt.err (!%p810_p0)
}
 0x212   :  { %s814_s12 = scalar_lea.hbm %s928_s5, 512 }
 0x213   :  { %p815_p1 = scmp.ne.s32.totalorder %s928_s5, %s814_s12  ;;  %p818_p2 = scmp.lt.u32.totalorder %s814_s12, %s928_s5 }
 0x215   :  { %p820_p3 = pnand %p818_p2, %p815_p1 }
 0x217   :  { %823 = shalt.err (!%p820_p3)
}
 0x218   :  { %521 = dma.vmem_to_hbm [thread:$0]  %s519_s9, 512, %s928_s5, [#allocation4]  }
 0x219   :  { %828 = dma.done.wait [#allocation4], 512  }
 0x21a   :  { %829 = vsyncadd [#allocation4], 4294966784 }
 0x21b   :  { %525 = vsyncpa [#allocation3], 1 }
 0x21c   :  { %526 = vsyncpa [#allocation6], 1 }
 0x21d   :  { %527 = vsyncpa [#allocation4], 1 }

</bundles_post_ra>
